<compile_context>
chip_gen: v7x
topology: tpu7x:2x2x1
jax: 0.10.0
libtpu: 0.0.40
codegen_flags: <defaults>
</compile_context>

<pallas_src>
import numpy as np
import jax
import jax.numpy as jnp
from jax.experimental import pallas as pl
from jax.experimental.pallas import tpu as pltpu


def fused_forward_kernel(x_ref, wc_ref, bc_ref, wh_ref, bh_ref, out_ref):
    # x: (TB, 64); wc: (64, 1024); bc: (1, 1024); wh: (1024, 128); bh: (1, 128)
    # conv (folded to a dense matrix) + bias + relu -> hidden in PyTorch
    # channel-major flatten order
    h = jnp.dot(x_ref[...], wc_ref[...], preferred_element_type=jnp.float32)
    h = jnp.maximum(h + bc_ref[...], 0.0)

    # fused policy + value head matmul (lane-dense N=128)
    z = jnp.dot(h, wh_ref[...], preferred_element_type=jnp.float32) + bh_ref[...]

    lane = jax.lax.broadcasted_iota(jnp.int32, z.shape, 1)
    is_policy = lane < 65
    zp = jnp.where(is_policy, z, jnp.float32(-1e30))   # mask value/pad lanes
    m = jnp.max(zp, axis=-1, keepdims=True)
    e = jnp.exp(zp - m)                                 # exactly 0 on masked lanes
    denom = jnp.sum(e, axis=-1, keepdims=True)
    probs = e * pl.reciprocal(denom, approx=False)      # exact (1e-5 tolerance)
    value = jnp.tanh(z)                                 # only lane 65 is kept

    out_ref[...] = jnp.where(lane == 65, value, probs)


def prepare_params(params):
    """One-time, offline (outside jit) weight preparation.

    Folds the 3x3/pad-1 conv into a dense (64, 1024) matrix whose columns are
    in PyTorch's channel-major flatten order, and packs the policy + value
    heads into one lane-dense (1024, 128) weight.
    """
    conv_w, conv_b, fc_w, fc_b, v_w, v_b = [np.asarray(p, np.float32) for p in params]
    C, H, W = 16, 8, 8
    P = H * W

    # hidden[b, c*64 + i*8 + j] = relu( sum_q x[b, q] * wconv[q, c*64+p] + bconv[c*64+p] )
    wconv = np.zeros((P, C, P), np.float32)             # [q, c, p]
    for di in range(3):
        for dj in range(3):
            for i in range(H):
                for j in range(W):
                    ii, jj = i + di - 1, j + dj - 1
                    if 0 <= ii < H and 0 <= jj < W:
                        wconv[ii * W + jj, :, i * W + j] = conv_w[:, 0, di, dj]
    wconv = wconv.reshape(P, C * P)                     # (64, 1024)
    bconv = np.repeat(conv_b, P).reshape(1, C * P)      # (1, 1024)

    # merged head: cols 0..64 = policy, col 65 = value, 66..127 = padding
    whead = np.zeros((C * P, 128), np.float32)
    whead[:, :65] = fc_w.T
    whead[:, 65] = v_w[0]
    bhead = np.zeros((1, 128), np.float32)
    bhead[0, :65] = fc_b
    bhead[0, 65] = v_b[0]

    return (jnp.asarray(wconv), jnp.asarray(bconv),
            jnp.asarray(whead), jnp.asarray(bhead))


def _round_up(n, m):
    return ((n + m - 1) // m) * m


def neural_network_forward(x, prepared):
    wconv, bconv, whead, bhead = prepared
    B = x.shape[0]
    x2d = x.reshape(B, 64)                              # free reshape (row-major)

    # ---- batch tiling ---------------------------------------------------
    TILE_CAP = 512                    # ~85% HBM roofline; < 8 MiB VMEM (fits v7x)
    b8 = _round_up(B, 8)              # sublane-aligned batch
    if b8 >= 16:
        # >= 2 grid steps so the "parallel" axis shards across both v7x cores
        tile_b = min(TILE_CAP, _round_up((b8 + 1) // 2, 8))
    else:
        tile_b = b8
    grid_n = (b8 + tile_b - 1) // tile_b
    b_pad = grid_n * tile_b
    if b_pad != B:
        # zero-pad: padded rows compute a harmless softmax and are sliced off
        x2d = jnp.pad(x2d, ((0, b_pad - B), (0, 0)))

    cost = pl.CostEstimate(
        flops=2 * b_pad * (64 * 1024 + 1024 * 128),
        transcendentals=2 * b_pad * 128,
        bytes_accessed=4 * (b_pad * 64 + 64 * 1024 + 1024
                            + 1024 * 128 + 128 + b_pad * 128),
    )

    out = pl.pallas_call(
        fused_forward_kernel,
        out_shape=jax.ShapeDtypeStruct((b_pad, 128), jnp.float32),
        grid_spec=pltpu.PrefetchScalarGridSpec(
            num_scalar_prefetch=0,
            grid=(grid_n,),
            in_specs=[
                pl.BlockSpec((tile_b, 64), lambda i: (i, 0)),
                pl.BlockSpec((64, 1024), lambda i: (0, 0)),
                pl.BlockSpec((1, 1024), lambda i: (0, 0)),
                pl.BlockSpec((1024, 128), lambda i: (0, 0)),
                pl.BlockSpec((1, 128), lambda i: (0, 0)),
            ],
            out_specs=pl.BlockSpec((tile_b, 128), lambda i: (i, 0)),
        ),
        compiler_params=pltpu.CompilerParams(dimension_semantics=("parallel",)),
        cost_estimate=cost,
    )(x2d, wconv, bconv, whead, bhead)

    return out[:B, :65], out[:B, 65:66]


def reference_forward(x, params):
    conv_w, conv_b, fc_w, fc_b, v_w, v_b = params
    y = jax.lax.conv_general_dilated(
        x, conv_w, window_strides=(1, 1), padding="SAME",
        dimension_numbers=("NCHW", "OIHW", "NCHW"))
    y = jnp.maximum(y + conv_b[None, :, None, None], 0.0)
    flat = y.reshape(x.shape[0], -1)
    logits = flat @ fc_w.T + fc_b
    val = flat @ v_w.T + v_b
    return jax.nn.softmax(logits, axis=-1), jnp.tanh(val)


if __name__ == "__main__":
    key = jax.random.PRNGKey(0)
    kx, kx2, k1, k2, k3, k4, k5, k6 = jax.random.split(key, 8)

    # Deterministic param init (PyTorch-default-style uniform bounds, fan_in based).
    cb = 1.0 / 3.0      # conv fan_in = 1*3*3
    lb = 1.0 / 32.0     # linear fan_in = 1024
    conv_w = jax.random.uniform(k1, (16, 1, 3, 3), jnp.float32, -cb, cb)
    conv_b = jax.random.uniform(k2, (16,), jnp.float32, -cb, cb)
    fc_w = jax.random.uniform(k3, (65, 16 * 8 * 8), jnp.float32, -lb, lb)
    fc_b = jax.random.uniform(k4, (65,), jnp.float32, -lb, lb)
    v_w = jax.random.uniform(k5, (1, 16 * 8 * 8), jnp.float32, -lb, lb)
    v_b = jax.random.uniform(k6, (1,), jnp.float32, -lb, lb)
    params = (conv_w, conv_b, fc_w, fc_b, v_w, v_b)

    # One-time weight preparation outside jit (offline folding / packing).
    prepared = prepare_params(params)
    fwd = jax.jit(neural_network_forward)

    # --- spec-sized batch (B=2, padded to 8 rows internally, grid=(1,)) ---
    B = 2
    x = jax.random.normal(kx, (B, 1, 8, 8), dtype=jnp.float32)
    policy, value = fwd(x, prepared)
    jax.block_until_ready((policy, value))
    ref_p, ref_v = reference_forward(x, params)
    assert policy.shape == (B, 65) and value.shape == (B, 1)
    assert jnp.allclose(policy, ref_p, atol=1e-5, rtol=1e-5)
    assert jnp.allclose(value, ref_v, atol=1e-5, rtol=1e-5)

    # --- larger batch exercising padding + multi-step grid (2 tiles) ------
    B2 = 40
    x2 = jax.random.normal(kx2, (B2, 1, 8, 8), dtype=jnp.float32)
    policy2, value2 = fwd(x2, prepared)
    jax.block_until_ready((policy2, value2))
    ref_p2, ref_v2 = reference_forward(x2, params)
    assert policy2.shape == (B2, 65) and value2.shape == (B2, 1)
    assert jnp.allclose(policy2, ref_p2, atol=1e-5, rtol=1e-5)
    assert jnp.allclose(value2, ref_v2, atol=1e-5, rtol=1e-5)

    print("KERNEL_OK")
</pallas_src>

<mosaic_0001>
module attributes {stable_mosaic.version = 11 : i64} {
  func.func @fused_forward_kernel(%arg0: i32, %arg1: memref<8x64xf32, #tpu.memory_space<vmem>>, %arg2: memref<64x1024xf32, #tpu.memory_space<vmem>>, %arg3: memref<1x1024xf32, #tpu.memory_space<vmem>>, %arg4: memref<1024x128xf32, #tpu.memory_space<vmem>>, %arg5: memref<1x128xf32, #tpu.memory_space<vmem>>, %arg6: memref<8x128xf32, #tpu.memory_space<vmem>>) attributes {dimension_semantics = [#tpu.dimension_semantics<parallel>], iteration_bounds = array<i64: 1>, scalar_prefetch = 0 : i64, scratch_operands = 0 : i64, tpu.core_type = #tpu.core_type<tc>, window_params = [{transform_indices = @transform_0, window_bounds = array<i64: 8, 64>}, {pipeline_mode = #tpu.pipeline_mode<synchronous>, transform_indices = @transform_1, window_bounds = array<i64: 64, 1024>}, {pipeline_mode = #tpu.pipeline_mode<synchronous>, transform_indices = @transform_2, window_bounds = array<i64: 1, 1024>}, {pipeline_mode = #tpu.pipeline_mode<synchronous>, transform_indices = @transform_3, window_bounds = array<i64: 1024, 128>}, {pipeline_mode = #tpu.pipeline_mode<synchronous>, transform_indices = @transform_4, window_bounds = array<i64: 1, 128>}, {transform_indices = @transform_5, window_bounds = array<i64: 8, 128>}]} {
    %c0 = arith.constant 0 : index
    %c0_0 = arith.constant 0 : index
    %0 = vector.load %arg1[%c0, %c0_0] : memref<8x64xf32, #tpu.memory_space<vmem>>, vector<8x64xf32>
    %c0_1 = arith.constant 0 : index
    %c0_2 = arith.constant 0 : index
    %1 = vector.load %arg2[%c0_1, %c0_2] : memref<64x1024xf32, #tpu.memory_space<vmem>>, vector<64x1024xf32>
    %cst = arith.constant dense<0.000000e+00> : vector<8x1024xf32>
    %2 = tpu.matmul %0, %1, %cst {dimension_numbers = #tpu.dot_dimension_numbers<[1], [0], [0], [1], [0, 0, 1, 1], [], []>} : vector<8x64xf32>, vector<64x1024xf32>, vector<8x1024xf32> -> vector<8x1024xf32>
    %c0_3 = arith.constant 0 : index
    %c0_4 = arith.constant 0 : index
    %3 = vector.load %arg3[%c0_3, %c0_4] : memref<1x1024xf32, #tpu.memory_space<vmem>>, vector<1x1024xf32>
    %4 = vector.broadcast %3 : vector<1x1024xf32> to vector<8x1024xf32>
    %5 = arith.addf %2, %4 : vector<8x1024xf32>
    %cst_5 = arith.constant 0.000000e+00 : f32
    %6 = vector.broadcast %cst_5 : f32 to vector<8x1024xf32>
    %7 = arith.maximumf %5, %6 : vector<8x1024xf32>
    %c0_6 = arith.constant 0 : index
    %c0_7 = arith.constant 0 : index
    %8 = vector.load %arg4[%c0_6, %c0_7] : memref<1024x128xf32, #tpu.memory_space<vmem>>, vector<1024x128xf32>
    %cst_8 = arith.constant dense<0.000000e+00> : vector<8x128xf32>
    %9 = tpu.matmul %7, %8, %cst_8 {dimension_numbers = #tpu.dot_dimension_numbers<[1], [0], [0], [1], [0, 0, 1, 1], [], []>} : vector<8x1024xf32>, vector<1024x128xf32>, vector<8x128xf32> -> vector<8x128xf32>
    %c0_9 = arith.constant 0 : index
    %c0_10 = arith.constant 0 : index
    %10 = vector.load %arg5[%c0_9, %c0_10] : memref<1x128xf32, #tpu.memory_space<vmem>>, vector<1x128xf32>
    %11 = vector.broadcast %10 : vector<1x128xf32> to vector<8x128xf32>
    %12 = arith.addf %9, %11 : vector<8x128xf32>
    %13 = tpu.iota {dimensions = array<i32: 1>} : vector<8x128xi32>
    %c65_i32 = arith.constant 65 : i32
    %14 = vector.broadcast %c65_i32 : i32 to vector<8x128xi32>
    %15 = arith.cmpi slt, %13, %14 : vector<8x128xi32>
    %cst_11 = arith.constant -1.000000e+30 : f32
    %16 = vector.broadcast %cst_11 : f32 to vector<8x128xf32>
    %17 = arith.select %15, %12, %16 : vector<8x128xi1>, vector<8x128xf32>
    %cst_12 = arith.constant dense<0xFF800000> : vector<8xf32>
    %18 = vector.multi_reduction <maximumf>, %17, %cst_12 [1] : vector<8x128xf32> to vector<8xf32>
    %19 = vector.shape_cast %18 : vector<8xf32> to vector<8x1xf32>
    %20 = vector.broadcast %19 : vector<8x1xf32> to vector<8x128xf32>
    %21 = arith.subf %17, %20 : vector<8x128xf32>
    %22 = math.exp %21 : vector<8x128xf32>
    %cst_13 = arith.constant dense<0.000000e+00> : vector<8xf32>
    %23 = vector.multi_reduction <add>, %22, %cst_13 [1] : vector<8x128xf32> to vector<8xf32>
    %24 = vector.shape_cast %23 : vector<8xf32> to vector<8x1xf32>
    %25 = tpu.reciprocal %24 : vector<8x1xf32> -> vector<8x1xf32>
    %26 = vector.broadcast %25 : vector<8x1xf32> to vector<8x128xf32>
    %27 = arith.mulf %22, %26 : vector<8x128xf32>
    %28 = math.tanh %12 : vector<8x128xf32>
    %c65_i32_14 = arith.constant 65 : i32
    %29 = vector.broadcast %c65_i32_14 : i32 to vector<8x128xi32>
    %30 = arith.cmpi eq, %13, %29 : vector<8x128xi32>
    %31 = arith.select %30, %28, %27 : vector<8x128xi1>, vector<8x128xf32>
    %c0_15 = arith.constant 0 : index
    %c0_16 = arith.constant 0 : index
    %32 = vector.load %arg6[%c0_15, %c0_16] : memref<8x128xf32, #tpu.memory_space<vmem>>, vector<8x128xf32>
    tpu.vector_store %arg6[%c0_15, %c0_16], %31 {strides = array<i32>} : memref<8x128xf32, #tpu.memory_space<vmem>>, vector<8x128xf32>,
    return
  }
  func.func @transform_0(%arg0: i32) -> (i32, i32) {
    %c0_i32 = arith.constant 0 : i32
    %c0_i32_0 = arith.constant 0 : i32
    return %arg0, %c0_i32 : i32, i32
  }
  func.func @transform_1(%arg0: i32) -> (i32, i32) {
    %c0_i32 = arith.constant 0 : i32
    %c0_i32_0 = arith.constant 0 : i32
    %c0_i32_1 = arith.constant 0 : i32
    return %c0_i32, %c0_i32_0 : i32, i32
  }
  func.func @transform_2(%arg0: i32) -> (i32, i32) {
    %c0_i32 = arith.constant 0 : i32
    %c0_i32_0 = arith.constant 0 : i32
    %c0_i32_1 = arith.constant 0 : i32
    return %c0_i32, %c0_i32_0 : i32, i32
  }
  func.func @transform_3(%arg0: i32) -> (i32, i32) {
    %c0_i32 = arith.constant 0 : i32
    %c0_i32_0 = arith.constant 0 : i32
    %c0_i32_1 = arith.constant 0 : i32
    return %c0_i32, %c0_i32_0 : i32, i32
  }
  func.func @transform_4(%arg0: i32) -> (i32, i32) {
    %c0_i32 = arith.constant 0 : i32
    %c0_i32_0 = arith.constant 0 : i32
    %c0_i32_1 = arith.constant 0 : i32
    return %c0_i32, %c0_i32_0 : i32, i32
  }
  func.func @transform_5(%arg0: i32) -> (i32, i32) {
    %c0_i32 = arith.constant 0 : i32
    %c0_i32_0 = arith.constant 0 : i32
    return %arg0, %c0_i32 : i32, i32
  }
}

</mosaic_0001>

<bundles_post_ra>
// kernel: neural_network_forward.1
= control target key start
LH: loop header
LB: loop body
LE: loop exit
PB: predicated region body
PF: predicated region fallthrough
CT: control target
= control target key end

     0   :  { %10 = vsyncpa [#allocation3], 0  ;;  %s1402_s0 = inlined_call_operand.vmem [shape: f32[8,64], index: 0, kind: input, shape index: {}]   ;;  %s1403_s1 = inlined_call_operand.hbm [shape: f32[64,1024], index: 1, kind: input, shape index: {}]   ;;  %s1404_s2 = inlined_call_operand.vmem [shape: f32[1,1024], index: 2, kind: input, shape index: {}]   ;;  %s1405_s3 = inlined_call_operand.hbm [shape: f32[1024,128], index: 3, kind: input, shape index: {}]   ;;  %s1406_s4 = inlined_call_operand.vmem [shape: f32[1,128], index: 4, kind: input, shape index: {}]   ;;  %s1407_s5 = inlined_call_operand.vmem [shape: f32[8,128], index: 5, kind: output, shape index: {}]  }
   0x1   :  { %11 = vsyncpa [#allocation5], 0  ;;  %s1287_s18 = smov [#allocation2]   ;;  %s1239_s22 = scalar_lea.hbm %s1403_s1, 8192 }
   0x2   :  { %s19_s19 = sshll.u32 %s1287_s18, 4  ;;  %p1240_p0 = scmp.ne.s32.totalorder %s1403_s1, %s1239_s22  ;;  %s20_s19 = int_to_ptr.vmem [resolvable:$true] %s19_s19 }
   0x3   :  { %p1243_p1 = scmp.lt.u32.totalorder %s1239_s22, %s1403_s1 }
   0x5   :  { %p1245_p2 = pnand %p1243_p1, %p1240_p0 }
   0x7   :  { %1248 = shalt.err (!%p1245_p2)
}
   0x8   :  { %s1249_s27 = scalar_lea.vmem %s20_s19, 8192  ;;  %p1254_p4 = scmp.lt.s32.totalorder %s20_s19, %s20_s19 }
   0x9   :  { %p1250_p3 = scmp.ne.s32.totalorder %s20_s19, %s1249_s27  ;;  %p1255_p5 = scmp.lt.s32.totalorder %s1249_s27, %s1249_s27 }
   0xb   :  { %p1256_p6 = por %p1255_p5, %p1254_p4 }
   0xd   :  { %p1257_p7 = pnand %p1256_p6, %p1250_p3 }
   0xf   :  { %1260 = shalt.err (!%p1257_p7)
}
  0x10   :  { %s1288_s28 = smov 1024   ;;  %s1289_s29 = smov 64  }
  0x11   :  { %25 = dma.hbm_to_vmem [thread:$0]  %s1403_s1, 8192, %s20_s19, [#allocation3], %s1288_s28, %s1288_s28, %s1289_s29  }
  0x12   :  { %s1290_s7 = smov [#allocation4]   ;;  %s1261_s11 = scalar_lea.hbm %s1405_s3, 16384 }
  0x13   :  { %s33_s8 = sshll.u32 %s1290_s7, 4  ;;  %p1262_p8 = scmp.ne.s32.totalorder %s1405_s3, %s1261_s11  ;;  %s34_s8 = int_to_ptr.vmem [resolvable:$true] %s33_s8 }
  0x14   :  { %p1265_p9 = scmp.lt.u32.totalorder %s1261_s11, %s1405_s3 }
  0x16   :  { %p1267_p10 = pnand %p1265_p9, %p1262_p8 }
  0x18   :  { %1270 = shalt.err (!%p1267_p10)
}
  0x19   :  { %s1271_s16 = scalar_lea.vmem %s34_s8, 16384  ;;  %p1276_p12 = scmp.lt.s32.totalorder %s34_s8, %s34_s8 }
  0x1a   :  { %p1272_p11 = scmp.ne.s32.totalorder %s34_s8, %s1271_s16  ;;  %p1277_p13 = scmp.lt.s32.totalorder %s1271_s16, %s1271_s16 }
  0x1c   :  { %p1278_p0 = por %p1277_p13, %p1276_p12 }
  0x1e   :  { %p1279_p1 = pnand %p1278_p0, %p1272_p11 }
  0x20   :  { %1282 = shalt.err (!%p1279_p1)
}
  0x21   :  { %s1291_s1 = smov 128   ;;  %s1292_s17 = smov 8  }
  0x22   :  { %39 = dma.hbm_to_vmem [thread:$0]  %s1405_s3, 16384, %s34_s8, [#allocation5], %s1291_s1, %s1291_s1, %s1292_s17  }
  0x23   :  { %1283 = dma.done.wait [#allocation3], 8192  }
  0x24   :  { %1284 = vsyncadd [#allocation3], 4294959104 }
  0x25   :  { %1285 = dma.done.wait [#allocation5], 16384  }
  0x26   :  { %1286 = vsyncadd [#allocation5], 4294950912  ;;  %v1293_v0 = vmov 0.0   ;;  %v50_v1 = vld [vmem:[#allocation2 + $0x8] sm:$0xff]  ;;  %v52_v3 = vld [vmem:[#allocation2 + $0x18] sm:$0xff]  ;;  %vm155_vm0 = vcmask 523264  }
  0x27   :  { %223 = vmatprep.mubr.f32.mxu0 %v1293_v0  ;;  %294 = vmatprep.mubr.f32.mxu1 %v1293_v0  ;;  %v58_v2 = vld [vmem:[#allocation2 + $0x48] sm:$0xff]  ;;  %v60_v5 = vld [vmem:[#allocation2 + $0x58] sm:$0xff]  ;;  %v49_v6 = vld [vmem:[#allocation2] sm:$0xff] }
  0x28   :  { %v1034_v4 = vpack.c.bf16 %v58_v2, %v50_v1  ;;  %v57_v7 = vld [vmem:[#allocation2 + $0x40] sm:$0xff]  ;;  %v1050_v8 = vpack.c.bf16 %v60_v5, %v52_v3  ;;  %v51_v10 = vld [vmem:[#allocation2 + $0x10] sm:$0xff]  ;;  %v66_v12 = vld [vmem:[#allocation2 + $0x88] sm:$0xff] }
  0x29   :  { %v1036_v9 = vpack.c.bf16 %v57_v7, %v49_v6  ;;  %v59_v11 = vld [vmem:[#allocation2 + $0x50] sm:$0xff]  ;;  %v74_v14 = vld [vmem:[#allocation2 + $0xc8] sm:$0xff]  ;;  %v68_v15 = vld [vmem:[#allocation2 + $0x98] sm:$0xff] }
  0x2a   :  { %1035 = vmatprep.subr.bf16.mxu0 %v1034_v4  ;;  %v1052_v13 = vpack.c.bf16 %v59_v11, %v51_v10  ;;  %v76_v16 = vld [vmem:[#allocation2 + $0xd8] sm:$0xff]  ;;  %1051 = vmatprep.subr.bf16.mxu1 %v1050_v8  ;;  %v1038_v17 = vpack.c.bf16 %v74_v14, %v66_v12  ;;  %v65_v19 = vld [vmem:[#allocation2 + $0x80] sm:$0xff]  ;;  %v67_v21 = vld [vmem:[#allocation2 + $0x90] sm:$0xff] }
  0x2b   :  { %1037 = vmatpush1.bf16.msra.mxu0 %v1036_v9  ;;  %v1054_v18 = vpack.c.bf16 %v76_v16, %v68_v15  ;;  %v73_v20 = vld [vmem:[#allocation2 + $0xc0] sm:$0xff]  ;;  %v75_v23 = vld [vmem:[#allocation2 + $0xd0] sm:$0xff]  ;;  %v82_v24 = vld [vmem:[#allocation2 + $0x108] sm:$0xff] }
  0x2c   :  { %1053 = vmatpush1.bf16.msra.mxu1 %v1052_v13  ;;  %v1040_v22 = vpack.c.bf16 %v73_v20, %v65_v19  ;;  %v90_v25 = vld [vmem:[#allocation2 + $0x148] sm:$0xff]  ;;  %1039 = vmatprep.subr.bf16.mxu0 %v1038_v17  ;;  %v1056_v26 = vpack.c.bf16 %v75_v23, %v67_v21  ;;  %v84_v28 = vld [vmem:[#allocation2 + $0x118] sm:$0xff]  ;;  %v81_v30 = vld [vmem:[#allocation2 + $0x100] sm:$0xff] }
  0x2d   :  { %1055 = vmatprep.subr.bf16.mxu1 %v1054_v18  ;;  %v1042_v27 = vpack.c.bf16 %v90_v25, %v82_v24  ;;  %v92_v29 = vld [vmem:[#allocation2 + $0x158] sm:$0xff]  ;;  %v89_v32 = vld [vmem:[#allocation2 + $0x140] sm:$0xff]  ;;  %v83_v33 = vld [vmem:[#allocation2 + $0x110] sm:$0xff] }
  0x2e   :  { %v1058_v31 = vpack.c.bf16 %v92_v29, %v84_v28  ;;  %v91_v34 = vld [vmem:[#allocation2 + $0x150] sm:$0xff]  ;;  %v1044_v35 = vpack.c.bf16 %v89_v32, %v81_v30  ;;  %v98_v36 = vld [vmem:[#allocation2 + $0x188] sm:$0xff]  ;;  %v100_v38 = vld [vmem:[#allocation2 + $0x198] sm:$0xff] }
  0x2f   :  { %1041 = vmatpush1.bf16.msra.mxu0 %v1040_v22  ;;  %v106_v37 = vld [vmem:[#allocation2 + $0x1c8] sm:$0xff]  ;;  %v1060_v39 = vpack.c.bf16 %v91_v34, %v83_v33  ;;  %v108_v41 = vld [vmem:[#allocation2 + $0x1d8] sm:$0xff]  ;;  %v97_v42 = vld [vmem:[#allocation2 + $0x180] sm:$0xff] }
  0x30   :  { %1057 = vmatpush1.bf16.msra.mxu1 %v1056_v26  ;;  %1043 = vmatprep.subr.bf16.mxu0 %v1042_v27  ;;  %v1046_v40 = vpack.c.bf16 %v106_v37, %v98_v36  ;;  %v105_v43 = vld [vmem:[#allocation2 + $0x1c0] sm:$0xff]  ;;  %v1062_v44 = vpack.c.bf16 %v108_v41, %v100_v38  ;;  %v99_v45 = vld [vmem:[#allocation2 + $0x190] sm:$0xff]  ;;  %v54_v47 = vld [vmem:[#allocation2 + $0x28] sm:$0xff] }
  0x31   :  { %1059 = vmatprep.subr.bf16.mxu1 %v1058_v31  ;;  %v107_v46 = vld [vmem:[#allocation2 + $0x1d0] sm:$0xff]  ;;  %v62_v48 = vld [vmem:[#allocation2 + $0x68] sm:$0xff]  ;;  %v1048_v49 = vpack.c.bf16 %v105_v43, %v97_v42  ;;  %v56_v50 = vld [vmem:[#allocation2 + $0x38] sm:$0xff] }
  0x32   :  { %v64_v51 = vld [vmem:[#allocation2 + $0x78] sm:$0xff]  ;;  %v1064_v52 = vpack.c.bf16 %v107_v46, %v99_v45  ;;  %v1066_v53 = vpack.c.bf16 %v62_v48, %v54_v47  ;;  %v53_v54 = vld [vmem:[#allocation2 + $0x20] sm:$0xff]  ;;  %v55_v56 = vld [vmem:[#allocation2 + $0x30] sm:$0xff] }
  0x33   :  { %1045 = vmatpush1.bf16.msra.mxu0 %v1044_v35  ;;  %v61_v55 = vld [vmem:[#allocation2 + $0x60] sm:$0xff]  ;;  %v1082_v57 = vpack.c.bf16 %v64_v51, %v56_v50  ;;  %v63_v58 = vld [vmem:[#allocation2 + $0x70] sm:$0xff]  ;;  %v70_v59 = vld [vmem:[#allocation2 + $0xa8] sm:$0xff] }
  0x34   :  { %1061 = vmatpush1.bf16.msra.mxu1 %v1060_v39  ;;  %1047 = vmatprep.subr.bf16.mxu0 %v1046_v40  ;;  %v78_v60 = vld [vmem:[#allocation2 + $0xe8] sm:$0xff]  ;;  %v72_v61 = vld [vmem:[#allocation2 + $0xb8] sm:$0xff]  ;;  %v1353_v63 = vld [vmem:[%s1402_s0] sm:$0xff]  ;;  %v1068_v1 = vpack.c.bf16 %v61_v55, %v53_v54  ;;  %v1084_v2 = vpack.c.bf16 %v63_v58, %v55_v56 }
  0x35   :  { %1063 = vmatprep.subr.bf16.mxu1 %v1062_v44  ;;  %v80_v62 = vld [vmem:[#allocation2 + $0xf8] sm:$0xff]  ;;  %v1070_v3 = vpack.c.bf16 %v78_v60, %v70_v59  ;;  %v69_v4 = vld [vmem:[#allocation2 + $0xa0] sm:$0xff]  ;;  %v71_v6 = vld [vmem:[#allocation2 + $0xb0] sm:$0xff] }
  0x36   :  { %v77_v5 = vld [vmem:[#allocation2 + $0xe0] sm:$0xff]  ;;  %v1086_v7 = vpack.c.bf16 %v80_v62, %v72_v61  ;;  %v79_v8 = vld [vmem:[#allocation2 + $0xf0] sm:$0xff]  ;;  %v86_v9 = vld [vmem:[#allocation2 + $0x128] sm:$0xff] }
  0x37   :  { %1049 = vmatpush1.bf16.msra.mxu0 %v1048_v49  ;;  %v94_v10 = vld [vmem:[#allocation2 + $0x168] sm:$0xff]  ;;  %v88_v11 = vld [vmem:[#allocation2 + $0x138] sm:$0xff]  ;;  %v1072_v13 = vpack.c.bf16 %v77_v5, %v69_v4  ;;  %v1088_v14 = vpack.c.bf16 %v79_v8, %v71_v6  ;;  %v85_v16 = vld [vmem:[#allocation2 + $0x120] sm:$0xff] }
  0x38   :  { %1065 = vmatpush1.bf16.msra.mxu1 %v1064_v52  ;;  %1067 = vmatprep.subr.bf16.mxu0 %v1066_v53  ;;  %v96_v12 = vld [vmem:[#allocation2 + $0x178] sm:$0xff]  ;;  %v1074_v15 = vpack.c.bf16 %v94_v10, %v86_v9  ;;  %v93_v17 = vld [vmem:[#allocation2 + $0x160] sm:$0xff]  ;;  %v87_v18 = vld [vmem:[#allocation2 + $0x130] sm:$0xff] }
  0x39   :  { %1083 = vmatprep.subr.bf16.mxu1 %v1082_v57  ;;  %v1090_v19 = vpack.c.bf16 %v96_v12, %v88_v11  ;;  %v95_v20 = vld [vmem:[#allocation2 + $0x170] sm:$0xff]  ;;  %v102_v21 = vld [vmem:[#allocation2 + $0x1a8] sm:$0xff]  ;;  %v104_v23 = vld [vmem:[#allocation2 + $0x1b8] sm:$0xff]  ;;  %v1076_v25 = vpack.c.bf16 %v93_v17, %v85_v16 }
  0x3a   :  { %889 = vmatmul.mubr.msk.f32.vlgmr.msra.gmra.mrb[0].mxu0 %vm155_vm0, %v1353_v63  ;;  %v110_v22 = vld [vmem:[#allocation2 + $0x1e8] sm:$0xff]  ;;  %v112_v24 = vld [vmem:[#allocation2 + $0x1f8] sm:$0xff]  ;;  %v1092_v26 = vpack.c.bf16 %v95_v20, %v87_v18  ;;  %v101_v28 = vld [vmem:[#allocation2 + $0x1a0] sm:$0xff] }
  0x3b   :  { %890 = vmatmul.mubr.msk.f32.vlgmr.msra.gmra.mrb[0].mxu1 %vm155_vm0, %v1353_v63  ;;  %1069 = vmatpush1.bf16.msra.mxu0 %v1068_v1  ;;  %v1078_v27 = vpack.c.bf16 %v110_v22, %v102_v21  ;;  %v109_v29 = vld [vmem:[#allocation2 + $0x1e0] sm:$0xff]  ;;  %v103_v30 = vld [vmem:[#allocation2 + $0x1b0] sm:$0xff]  ;;  %v1094_v31 = vpack.c.bf16 %v112_v24, %v104_v23  ;;  %v468_v34 = vld [vmem:[#allocation4 + $0x88] sm:$0xff] }
  0x3c   :  { %1085 = vmatpush1.bf16.msra.mxu1 %v1084_v2  ;;  %1071 = vmatprep.subr.bf16.mxu0 %v1070_v3  ;;  %v111_v32 = vld [vmem:[#allocation2 + $0x1f0] sm:$0xff]  ;;  %v467_v33 = vld [vmem:[#allocation4 + $0x80] sm:$0xff]  ;;  %v500_v36 = vld [vmem:[#allocation4 + $0x188] sm:$0xff]  ;;  %v1080_v37 = vpack.c.bf16 %v109_v29, %v101_v28 }
  0x3d   :  { %1087 = vmatprep.subr.bf16.mxu1 %v1086_v7  ;;  %365 = vmatprep.mubr.f32.mxu0 %v1293_v0  ;;  %v499_v35 = vld [vmem:[#allocation4 + $0x180] sm:$0xff]  ;;  %v1098_v38 = vpack.c.bf16 %v468_v34, %v467_v33  ;;  %v452_v40 = vld [vmem:[#allocation4 + $0x8] sm:$0xff]  ;;  %v469_v44 = vld [vmem:[#allocation4 + $0x90] sm:$0xff] }
  0x3e   :  { %436 = vmatprep.mubr.f32.mxu1 %v1293_v0  ;;  %v1096_v0 = vpack.c.bf16 %v111_v32, %v103_v30  ;;  %v451_v39 = vld [vmem:[#allocation4] sm:$0xff]  ;;  %v1130_v42 = vpack.c.bf16 %v500_v36, %v499_v35  ;;  %v484_v43 = vld [vmem:[#allocation4 + $0x108] sm:$0xff]  ;;  %v470_v45 = vld [vmem:[#allocation4 + $0x98] sm:$0xff] }
  0x3f   :  { %1073 = vmatpush1.bf16.msra.mxu0 %v1072_v13  ;;  %v483_v41 = vld [vmem:[#allocation4 + $0x100] sm:$0xff]  ;;  %v501_v46 = vld [vmem:[#allocation4 + $0x190] sm:$0xff]  ;;  %v502_v47 = vld [vmem:[#allocation4 + $0x198] sm:$0xff]  ;;  %v1100_v48 = vpack.c.bf16 %v452_v40, %v451_v39  ;;  %v1102_v50 = vpack.c.bf16 %v470_v45, %v469_v44 }
  0x40   :  { %1089 = vmatpush1.bf16.msra.mxu1 %v1088_v14  ;;  %1075 = vmatprep.subr.bf16.mxu0 %v1074_v15  ;;  %v1132_v49 = vpack.c.bf16 %v484_v43, %v483_v41  ;;  %v453_v51 = vld [vmem:[#allocation4 + $0x10] sm:$0xff]  ;;  %v454_v52 = vld [vmem:[#allocation4 + $0x18] sm:$0xff]  ;;  %v1134_v54 = vpack.c.bf16 %v502_v47, %v501_v46  ;;  %v471_v56 = vld [vmem:[#allocation4 + $0xa0] sm:$0xff] }
  0x41   :  { %1091 = vmatprep.subr.bf16.mxu1 %v1090_v19  ;;  %v485_v53 = vld [vmem:[#allocation4 + $0x110] sm:$0xff]  ;;  %v486_v55 = vld [vmem:[#allocation4 + $0x118] sm:$0xff]  ;;  %v472_v57 = vld [vmem:[#allocation4 + $0xa8] sm:$0xff]  ;;  %v1104_v60 = vpack.c.bf16 %v454_v52, %v453_v51 }
  0x42   :  { %v503_v58 = vld [vmem:[#allocation4 + $0x1a0] sm:$0xff]  ;;  %v504_v59 = vld [vmem:[#allocation4 + $0x1a8] sm:$0xff]  ;;  %v1136_v61 = vpack.c.bf16 %v486_v55, %v485_v53  ;;  %v1106_v62 = vpack.c.bf16 %v472_v57, %v471_v56  ;;  %v473_v6 = vld [vmem:[#allocation4 + $0xb0] sm:$0xff] }
  0x43   :  { %1077 = vmatpush1.bf16.msra.mxu0 %v1076_v25  ;;  %v455_v1 = vld [vmem:[#allocation4 + $0x20] sm:$0xff]  ;;  %v456_v2 = vld [vmem:[#allocation4 + $0x28] sm:$0xff]  ;;  %v1138_v4 = vpack.c.bf16 %v504_v59, %v503_v58  ;;  %v474_v7 = vld [vmem:[#allocation4 + $0xb8] sm:$0xff] }
  0x44   :  { %1093 = vmatpush1.bf16.msra.mxu1 %v1092_v26  ;;  %1079 = vmatprep.subr.bf16.mxu0 %v1078_v27  ;;  %v487_v3 = vld [vmem:[#allocation4 + $0x120] sm:$0xff]  ;;  %v488_v5 = vld [vmem:[#allocation4 + $0x128] sm:$0xff]  ;;  %v505_v8 = vld [vmem:[#allocation4 + $0x1b0] sm:$0xff]  ;;  %v1108_v10 = vpack.c.bf16 %v456_v2, %v455_v1  ;;  %v1110_v11 = vpack.c.bf16 %v474_v7, %v473_v6 }
  0x45   :  { %1095 = vmatprep.subr.bf16.mxu1 %v1094_v31  ;;  %v506_v9 = vld [vmem:[#allocation4 + $0x1b8] sm:$0xff]  ;;  %v457_v12 = vld [vmem:[#allocation4 + $0x30] sm:$0xff]  ;;  %v475_v17 = vld [vmem:[#allocation4 + $0xc0] sm:$0xff] }
  0x46   :  { %v458_v13 = vld [vmem:[#allocation4 + $0x38] sm:$0xff]  ;;  %v489_v14 = vld [vmem:[#allocation4 + $0x130] sm:$0xff]  ;;  %v1142_v15 = vpack.c.bf16 %v506_v9, %v505_v8  ;;  %v476_v18 = vld [vmem:[#allocation4 + $0xc8] sm:$0xff] }
  0x47   :  { %1081 = vmatpush1.bf16.msra.mxu0 %v1080_v37  ;;  %v490_v16 = vld [vmem:[#allocation4 + $0x138] sm:$0xff]  ;;  %v507_v19 = vld [vmem:[#allocation4 + $0x1c0] sm:$0xff]  ;;  %v508_v20 = vld [vmem:[#allocation4 + $0x1c8] sm:$0xff]  ;;  %v1112_v21 = vpack.c.bf16 %v458_v13, %v457_v12  ;;  %v1114_v23 = vpack.c.bf16 %v476_v18, %v475_v17 }
  0x48   :  { %1097 = vmatpush1.bf16.msra.mxu1 %v1096_v0  ;;  %1099 = vmatprep.subr.bf16.mxu0 %v1098_v38  ;;  %v1144_v22 = vpack.c.bf16 %v490_v16, %v489_v14  ;;  %v459_v24 = vld [vmem:[#allocation4 + $0x40] sm:$0xff]  ;;  %v460_v25 = vld [vmem:[#allocation4 + $0x48] sm:$0xff]  ;;  %v1146_v27 = vpack.c.bf16 %v508_v20, %v507_v19  ;;  %v477_v29 = vld [vmem:[#allocation4 + $0xd0] sm:$0xff] }
  0x49   :  { %1131 = vmatprep.subr.bf16.mxu1 %v1130_v42  ;;  %v491_v26 = vld [vmem:[#allocation4 + $0x140] sm:$0xff]  ;;  %v492_v28 = vld [vmem:[#allocation4 + $0x148] sm:$0xff]  ;;  %v478_v30 = vld [vmem:[#allocation4 + $0xd8] sm:$0xff]  ;;  %v1116_v33 = vpack.c.bf16 %v460_v25, %v459_v24 }
  0x4a   :  { %891 = vmatmul.mubr.msk.f32.vlgmr.msra.gmra.mrb[2].mxu0 %vm155_vm0, %v1353_v63  ;;  %v509_v31 = vld [vmem:[#allocation4 + $0x1d0] sm:$0xff]  ;;  %v510_v32 = vld [vmem:[#allocation4 + $0x1d8] sm:$0xff]  ;;  %v1148_v34 = vpack.c.bf16 %v492_v28, %v491_v26  ;;  %v1118_v35 = vpack.c.bf16 %v478_v30, %v477_v29  ;;  %v479_v40 = vld [vmem:[#allocation4 + $0xe0] sm:$0xff] }
  0x4b   :  { %892 = vmatmul.mubr.msk.f32.vlgmr.msra.gmra.mrb[2].mxu1 %vm155_vm0, %v1353_v63  ;;  %1101 = vmatpush3.bf16.msra.mxu0 %v1100_v48  ;;  %v1140_v63 = vpack.c.bf16 %v488_v5, %v487_v3  ;;  %v461_v36 = vld [vmem:[#allocation4 + $0x50] sm:$0xff]  ;;  %v462_v37 = vld [vmem:[#allocation4 + $0x58] sm:$0xff]  ;;  %v1150_v38 = vpack.c.bf16 %v510_v32, %v509_v31  ;;  %v480_v41 = vld [vmem:[#allocation4 + $0xe8] sm:$0xff] }
  0x4c   :  { %1133 = vmatpush3.bf16.msra.mxu1 %v1132_v49  ;;  %1103 = vmatprep.subr.bf16.mxu0 %v1102_v50  ;;  %v493_v0 = vld [vmem:[#allocation4 + $0x150] sm:$0xff]  ;;  %v494_v39 = vld [vmem:[#allocation4 + $0x158] sm:$0xff]  ;;  %v511_v42 = vld [vmem:[#allocation4 + $0x1e0] sm:$0xff]  ;;  %v1120_v44 = vpack.c.bf16 %v462_v37, %v461_v36  ;;  %v1122_v46 = vpack.c.bf16 %v480_v41, %v479_v40 }
  0x4d   :  { %1135 = vmatprep.subr.bf16.mxu1 %v1134_v54  ;;  %v512_v43 = vld [vmem:[#allocation4 + $0x1e8] sm:$0xff]  ;;  %v1152_v45 = vpack.c.bf16 %v494_v39, %v493_v0  ;;  %v463_v47 = vld [vmem:[#allocation4 + $0x60] sm:$0xff]  ;;  %v481_v54 = vld [vmem:[#allocation4 + $0xf0] sm:$0xff] }
  0x4e   :  { %v464_v48 = vld [vmem:[#allocation4 + $0x68] sm:$0xff]  ;;  %v1154_v49 = vpack.c.bf16 %v512_v43, %v511_v42  ;;  %v495_v50 = vld [vmem:[#allocation4 + $0x160] sm:$0xff]  ;;  %v482_v55 = vld [vmem:[#allocation4 + $0xf8] sm:$0xff] }
  0x4f   :  { %1105 = vmatpush3.bf16.msra.mxu0 %v1104_v60  ;;  %v496_v51 = vld [vmem:[#allocation4 + $0x168] sm:$0xff]  ;;  %v1124_v52 = vpack.c.bf16 %v464_v48, %v463_v47  ;;  %v513_v56 = vld [vmem:[#allocation4 + $0x1f0] sm:$0xff]  ;;  %v1126_v57 = vpack.c.bf16 %v482_v55, %v481_v54  ;;  %v514_v58 = vld [vmem:[#allocation4 + $0x1f8] sm:$0xff] }
  0x50   :  { %1137 = vmatpush3.bf16.msra.mxu1 %v1136_v61  ;;  %1107 = vmatprep.subr.bf16.mxu0 %v1106_v62  ;;  %v1156_v53 = vpack.c.bf16 %v496_v51, %v495_v50  ;;  %v465_v59 = vld [vmem:[#allocation4 + $0x70] sm:$0xff]  ;;  %v466_v60 = vld [vmem:[#allocation4 + $0x78] sm:$0xff]  ;;  %v1158_v61 = vpack.c.bf16 %v514_v58, %v513_v56  ;;  %v532_v5 = vld [vmem:[#allocation4 + $0x288] sm:$0xff] }
  0x51   :  { %1139 = vmatprep.subr.bf16.mxu1 %v1138_v4  ;;  %v1128_v62 = vpack.c.bf16 %v466_v60, %v465_v59  ;;  %v497_v1 = vld [vmem:[#allocation4 + $0x170] sm:$0xff]  ;;  %v498_v2 = vld [vmem:[#allocation4 + $0x178] sm:$0xff]  ;;  %v531_v4 = vld [vmem:[#allocation4 + $0x280] sm:$0xff] }
  0x52   :  { %v1160_v3 = vpack.c.bf16 %v498_v2, %v497_v1  ;;  %v563_v6 = vld [vmem:[#allocation4 + $0x380] sm:$0xff]  ;;  %v1162_v7 = vpack.c.bf16 %v532_v5, %v531_v4  ;;  %v564_v8 = vld [vmem:[#allocation4 + $0x388] sm:$0xff]  ;;  %v533_v31 = vld [vmem:[#allocation4 + $0x290] sm:$0xff] }
  0x53   :  { %1109 = vmatpush3.bf16.msra.mxu0 %v1108_v10  ;;  %v1194_v9 = vpack.c.bf16 %v564_v8, %v563_v6  ;;  %v115_v10 = vlaneseq  ;;  %v1372_v12 = vld [vmem:[%s1404_s2] sm:$0xff]  ;;  %v516_v25 = vld [vmem:[#allocation4 + $0x208] sm:$0xff]  ;;  %v534_v32 = vld [vmem:[#allocation4 + $0x298] sm:$0xff] }
  0x54   :  { %1141 = vmatpush3.bf16.msra.mxu1 %v1140_v63  ;;  %1111 = vmatprep.subr.bf16.mxu0 %v1110_v11  ;;  %v515_v24 = vld [vmem:[#allocation4 + $0x200] sm:$0xff]  ;;  %v548_v30 = vld [vmem:[#allocation4 + $0x308] sm:$0xff]  ;;  %v1166_v41 = vpack.c.bf16 %v534_v32, %v533_v31  ;;  %v517_v42 = vld [vmem:[#allocation4 + $0x210] sm:$0xff] }
  0x55   :  { %1143 = vmatprep.subr.bf16.mxu1 %v1142_v15  ;;  %v1366_v63 = vshrl.u32 %v115_v10, 7  ;;  %v547_v26 = vld [vmem:[#allocation4 + $0x300] sm:$0xff]  ;;  %v1164_v0 = vpack.c.bf16 %v516_v25, %v515_v24  ;;  %v518_v43 = vld [vmem:[#allocation4 + $0x218] sm:$0xff]  ;;  %v536_v48 = vld [vmem:[#allocation4 + $0x2a8] sm:$0xff] }
  0x56   :  { %v1196_v40 = vpack.c.bf16 %v548_v30, %v547_v26  ;;  %v535_v47 = vld [vmem:[#allocation4 + $0x2a0] sm:$0xff]  ;;  %v568_v50 = vld [vmem:[#allocation4 + $0x3a8] sm:$0xff]  ;;  %v1168_v51 = vpack.c.bf16 %v518_v43, %v517_v42  ;;  %v537_v59 = vld [vmem:[#allocation4 + $0x2b0] sm:$0xff] }
  0x57   :  { %1113 = vmatpush3.bf16.msra.mxu0 %v1112_v21  ;;  %v117_v11 = vsub.s32 0, %v1366_v63  ;;  %v125_v13 = vsub.s32 2, %v1366_v63  ;;  %v121_v14 = vsub.s32 1, %v1366_v63  ;;  %v129_v15 = vsub.s32 3, %v1366_v63  ;;  %v519_v54 = vld [vmem:[#allocation4 + $0x220] sm:$0xff]  ;;  %v520_v55 = vld [vmem:[#allocation4 + $0x228] sm:$0xff] }
  0x58   :  { %1145 = vmatpush3.bf16.msra.mxu1 %v1144_v22  ;;  %1115 = vmatprep.subr.bf16.mxu0 %v1114_v23  ;;  %v551_v56 = vld [vmem:[#allocation4 + $0x320] sm:$0xff]  ;;  %v552_v58 = vld [vmem:[#allocation4 + $0x328] sm:$0xff]  ;;  %v538_v60 = vld [vmem:[#allocation4 + $0x2b8] sm:$0xff]  ;;  %v145_v2 = vsub.s32 7, %v1366_v63 }
  0x59   :  { %1147 = vmatprep.subr.bf16.mxu1 %v1146_v27  ;;  %v118_v16 = vrot.slane %v1372_v12, %v117_v11  ;;  %v126_v17 = vrot.slane %v1372_v12, %v125_v13  ;;  %v122_v18 = vrot.slane %v1372_v12, %v121_v14  ;;  %v130_v19 = vrot.slane %v1372_v12, %v129_v15  ;;  %v570_v1 = vld [vmem:[#allocation4 + $0x3b8] sm:$0xff]  ;;  %v521_v6 = vld [vmem:[#allocation4 + $0x230] sm:$0xff]  ;;  %v539_v13 = vld [vmem:[#allocation4 + $0x2c0] sm:$0xff] }
  0x5a   :  { %v1204_v4 = vpack.c.bf16 %v552_v58, %v551_v56  ;;  %v1174_v5 = vpack.c.bf16 %v538_v60, %v537_v59  ;;  %v553_v8 = vld [vmem:[#allocation4 + $0x330] sm:$0xff]  ;;  %v554_v11 = vld [vmem:[#allocation4 + $0x338] sm:$0xff]  ;;  %v540_v14 = vld [vmem:[#allocation4 + $0x2c8] sm:$0xff] }
  0x5b   :  { %1117 = vmatpush3.bf16.msra.mxu0 %v1116_v33  ;;  %v524_v24 = vld [vmem:[#allocation4 + $0x248] sm:$0xff]  ;;  %v555_v25 = vld [vmem:[#allocation4 + $0x340] sm:$0xff]  ;;  %v541_v30 = vld [vmem:[#allocation4 + $0x2d0] sm:$0xff] }
  0x5c   :  { %1149 = vmatpush3.bf16.msra.mxu1 %v1148_v34  ;;  %1119 = vmatprep.subr.bf16.mxu0 %v1118_v35  ;;  %v565_v34 = vld [vmem:[#allocation4 + $0x390] sm:$0xff]  ;;  %v566_v35 = vld [vmem:[#allocation4 + $0x398] sm:$0xff]  ;;  %v528_v56 = vld [vmem:[#allocation4 + $0x268] sm:$0xff] }
  0x5d   :  { %1151 = vmatprep.subr.bf16.mxu1 %v1150_v38  ;;  %v542_v31 = vld [vmem:[#allocation4 + $0x2d8] sm:$0xff]  ;;  %v557_v42 = vld [vmem:[#allocation4 + $0x350] sm:$0xff]  ;;  %v560_v59 = vld [vmem:[#allocation4 + $0x368] sm:$0xff] }
  0x5e   :  { %v545_v60 = vld [vmem:[#allocation4 + $0x2f0] sm:$0xff] }
  0x5f   :  { %1121 = vmatpush3.bf16.msra.mxu0 %v1120_v44  ;;  %v549_v44 = vld [vmem:[#allocation4 + $0x310] sm:$0xff] }
  0x60   :  { %1153 = vmatpush3.bf16.msra.mxu1 %v1152_v45  ;;  %1123 = vmatprep.subr.bf16.mxu0 %v1122_v46  ;;  %v1198_v45 = vpack.c.bf16 %v566_v35, %v565_v34  ;;  %v550_v46 = vld [vmem:[#allocation4 + $0x318] sm:$0xff]  ;;  %v573_v34 = vld [vmem:[#allocation4 + $0x3d0] sm:$0xff] }
  0x61   :  { %1155 = vmatprep.subr.bf16.mxu1 %v1154_v49  ;;  %v567_v49 = vld [vmem:[#allocation4 + $0x3a0] sm:$0xff]  ;;  %v574_v35 = vld [vmem:[#allocation4 + $0x3d8] sm:$0xff] }
  0x63   :  { %1125 = vmatpush3.bf16.msra.mxu0 %v1124_v52  ;;  %v1200_v52 = vpack.c.bf16 %v550_v46, %v549_v44  ;;  %v1214_v44 = vpack.c.bf16 %v574_v35, %v573_v34  ;;  %v543_v46 = vld [vmem:[#allocation4 + $0x2e0] sm:$0xff] }
  0x64   :  { %1157 = vmatpush3.bf16.msra.mxu1 %v1156_v53  ;;  %1127 = vmatprep.subr.bf16.mxu0 %v1126_v57  ;;  %v1170_v53 = vpack.c.bf16 %v536_v48, %v535_v47  ;;  %v1202_v57 = vpack.c.bf16 %v568_v50, %v567_v49  ;;  %v544_v47 = vld [vmem:[#allocation4 + $0x2e8] sm:$0xff]  ;;  %v575_v48 = vld [vmem:[#allocation4 + $0x3e0] sm:$0xff] }
  0x65   :  { %1159 = vmatprep.subr.bf16.mxu1 %v1158_v61  ;;  %v137_v61 = vsub.s32 5, %v1366_v63  ;;  %v576_v49 = vld [vmem:[#allocation4 + $0x3e8] sm:$0xff] }
  0x66   :  { %v1218_v58 = vpack.c.bf16 %v576_v49, %v575_v48 }
  0x67   :  { %1129 = vmatpush3.bf16.msra.mxu0 %v1128_v62  ;;  %v569_v62 = vld [vmem:[#allocation4 + $0x3b0] sm:$0xff]  ;;  %v138_v15 = vrot.slane %v1372_v12, %v137_v61  ;;  %v546_v61 = vld [vmem:[#allocation4 + $0x2f8] sm:$0xff] }
  0x68   :  { %1161 = vmatpush3.bf16.msra.mxu1 %v1160_v3  ;;  %1163 = vmatprep.subr.bf16.mxu0 %v1162_v7  ;;  %v1172_v3 = vpack.c.bf16 %v520_v55, %v519_v54  ;;  %v522_v7 = vld [vmem:[#allocation4 + $0x238] sm:$0xff]  ;;  %v1186_v54 = vpack.c.bf16 %v544_v47, %v543_v46  ;;  %v527_v55 = vld [vmem:[#allocation4 + $0x260] sm:$0xff] }
  0x69   :  { %1195 = vmatprep.subr.bf16.mxu1 %v1194_v9  ;;  %v1206_v9 = vpack.c.bf16 %v570_v1, %v569_v62  ;;  %v577_v62 = vld [vmem:[#allocation4 + $0x3f0] sm:$0xff]  ;;  %v578_v1 = vld [vmem:[#allocation4 + $0x3f8] sm:$0xff] }
 0x10d   :  { %v225_v20 = vpop.f32.mrb[0].mxu0 }
 0x10e   :  { %v226_v21 = vadd.f32 %v225_v20, %v118_v16  ;;  %v296_v22 = vpop.f32.mrb[0].mxu1  ;;  %v227_v23 = vpop.f32.mrb[1].mxu0  ;;  %v571_v16 = vld [vmem:[#allocation4 + $0x3c0] sm:$0xff] }
 0x10f   :  { %v297_v27 = vadd.f32 %v296_v22, %v126_v17  ;;  %v228_v28 = vadd.f32 %v227_v23, %v122_v18  ;;  %v298_v29 = vpop.f32.mrb[1].mxu1  ;;  %v572_v17 = vld [vmem:[#allocation4 + $0x3c8] sm:$0xff]  ;;  %v146_v18 = vrot.slane %v1372_v12, %v145_v2  ;;  %v1178_v22 = vpack.c.bf16 %v540_v14, %v539_v13  ;;  %v523_v23 = vld [vmem:[#allocation4 + $0x240] sm:$0xff] }
 0x110   :  { %v299_v33 = vadd.f32 %v298_v29, %v130_v19  ;;  %v443_v38 = vmax.f32 %v226_v21, 0.0  ;;  %v1176_v19 = vpack.c.bf16 %v522_v7, %v521_v6  ;;  %v1208_v21 = vpack.c.bf16 %v554_v11, %v553_v8  ;;  %v556_v29 = vld [vmem:[#allocation4 + $0x348] sm:$0xff]  ;;  %v529_v6 = vld [vmem:[#allocation4 + $0x270] sm:$0xff]  ;;  %v530_v7 = vld [vmem:[#allocation4 + $0x278] sm:$0xff] }
 0x111   :  { %v445_v36 = vmax.f32 %v297_v27, 0.0  ;;  %v444_v37 = vmax.f32 %v228_v28, 0.0  ;;  %v1210_v28 = vpack.c.bf16 %v572_v17, %v571_v16  ;;  %v1222_v8 = vpack.c.bf16 %v578_v1, %v577_v62  ;;  %v562_v11 = vld [vmem:[#allocation4 + $0x378] sm:$0xff] }
 0x112   :  { %v446_v39 = vmax.f32 %v299_v33, 0.0  ;;  %v1192_v14 = vpack.c.bf16 %v530_v7, %v529_v6 }
 0x113   :  { %650 = vmatprep.mubr.f32.mxu0 %v444_v37  ;;  %v1180_v37 = vpack.c.bf16 %v524_v24, %v523_v23 }
 0x114   :  { %720 = vmatprep.mubr.f32.mxu1 %v446_v39  ;;  %651 = vmatmul.mubr.f32.vlgmr.msra.gmra.mrb[4].mxu0 %v443_v38  ;;  %v1212_v38 = vpack.c.bf16 %v556_v29, %v555_v25  ;;  %v1182_v39 = vpack.c.bf16 %v542_v31, %v541_v30  ;;  %v867_v30 = vand.u32 127, %v115_v10 }
 0x115   :  { %721 = vmatmul.mubr.f32.vlgmr.msra.gmra.mrb[4].mxu1 %v445_v36  ;;  %1165 = vmatpush3.bf16.msra.mxu0 %v1164_v0 }
 0x116   :  { %1197 = vmatpush3.bf16.msra.mxu1 %v1196_v40  ;;  %1167 = vmatprep.subr.bf16.mxu0 %v1166_v41  ;;  %v525_v40 = vld [vmem:[#allocation4 + $0x250] sm:$0xff]  ;;  %v526_v41 = vld [vmem:[#allocation4 + $0x258] sm:$0xff]  ;;  %vm868_vm1 = vcmp.lt.s32.totalorder %v867_v30, 65  ;;  %vm880_vm2 = vcmp.eq.s32.totalorder %v867_v30, 65 }
 0x117   :  { %1199 = vmatprep.subr.bf16.mxu1 %v1198_v45  ;;  %v558_v45 = vld [vmem:[#allocation4 + $0x358] sm:$0xff]  ;;  %v1184_v50 = vpack.c.bf16 %v526_v41, %v525_v40 }
 0x119   :  { %1169 = vmatpush3.bf16.msra.mxu0 %v1168_v51  ;;  %v141_v51 = vsub.s32 6, %v1366_v63 }
 0x11a   :  { %1201 = vmatpush3.bf16.msra.mxu1 %v1200_v52  ;;  %1171 = vmatprep.subr.bf16.mxu0 %v1170_v53  ;;  %v1216_v52 = vpack.c.bf16 %v558_v45, %v557_v42  ;;  %v133_v53 = vsub.s32 4, %v1366_v63 }
 0x11b   :  { %1203 = vmatprep.subr.bf16.mxu1 %v1202_v57  ;;  %v559_v57 = vld [vmem:[#allocation4 + $0x360] sm:$0xff]  ;;  %v142_v2 = vrot.slane %v1372_v12, %v141_v51 }
 0x11c   :  { %v1220_v63 = vpack.c.bf16 %v560_v59, %v559_v57 }
 0x11d   :  { %1173 = vmatpush3.bf16.msra.mxu0 %v1172_v3  ;;  %v1385_v20 = vpop.f32.mrb[2].mxu0  ;;  %v1188_v3 = vpack.c.bf16 %v528_v56, %v527_v55 }
 0x11e   :  { %1205 = vmatpush3.bf16.msra.mxu1 %v1204_v4  ;;  %1175 = vmatprep.subr.bf16.mxu0 %v1174_v5  ;;  %v369_v26 = vpop.f32.mrb[3].mxu0  ;;  %v1387_v27 = vpop.f32.mrb[2].mxu1  ;;  %v134_v4 = vrot.slane %v1372_v12, %v133_v53  ;;  %v1190_v5 = vpack.c.bf16 %v546_v61, %v545_v60 }
 0x11f   :  { %1207 = vmatprep.subr.bf16.mxu1 %v1206_v9  ;;  %v370_v32 = vadd.f32 %v369_v26, %v138_v15  ;;  %v440_v33 = vpop.f32.mrb[3].mxu1  ;;  %v561_v9 = vld [vmem:[#allocation4 + $0x370] sm:$0xff]  ;;  %v439_v13 = vadd.f32 %v1387_v27, %v142_v2 }
 0x120   :  { %v441_v36 = vadd.f32 %v440_v33, %v146_v18  ;;  %v368_v15 = vadd.f32 %v1385_v20, %v134_v4  ;;  %v1224_v16 = vpack.c.bf16 %v562_v11, %v561_v9 }
 0x121   :  { %1177 = vmatpush3.bf16.msra.mxu0 %v1176_v19  ;;  %v448_v0 = vmax.f32 %v370_v32, 0.0  ;;  %v449_v12 = vmax.f32 %v439_v13, 0.0 }
 0x122   :  { %1209 = vmatpush3.bf16.msra.mxu1 %v1208_v21  ;;  %1179 = vmatprep.subr.bf16.mxu0 %v1178_v22  ;;  %v450_v43 = vmax.f32 %v441_v36, 0.0  ;;  %v447_v17 = vmax.f32 %v368_v15, 0.0  ;;  %v893_v21 = vld [vmem:[%s1406_s4] ss:$0 sm:$0xff] }
 0x123   :  { %1211 = vmatprep.subr.bf16.mxu1 %v1210_v28  ;;  %790 = vmatprep.mubr.f32.mxu0 %v448_v0 }
 0x124   :  { %860 = vmatprep.mubr.f32.mxu1 %v450_v43 }
 0x125   :  { %1181 = vmatpush3.bf16.msra.mxu0 %v1180_v37 }
 0x126   :  { %1213 = vmatpush3.bf16.msra.mxu1 %v1212_v38  ;;  %1183 = vmatprep.subr.bf16.mxu0 %v1182_v39 }
 0x127   :  { %1215 = vmatprep.subr.bf16.mxu1 %v1214_v44 }
 0x129   :  { %1185 = vmatpush3.bf16.msra.mxu0 %v1184_v50 }
 0x12a   :  { %1217 = vmatpush3.bf16.msra.mxu1 %v1216_v52  ;;  %1187 = vmatprep.subr.bf16.mxu0 %v1186_v54 }
 0x12b   :  { %1219 = vmatprep.subr.bf16.mxu1 %v1218_v58 }
 0x12d   :  { %1189 = vmatpush3.bf16.msra.mxu0 %v1188_v3 }
 0x12e   :  { %1221 = vmatpush3.bf16.msra.mxu1 %v1220_v63  ;;  %1191 = vmatprep.subr.bf16.mxu0 %v1190_v5 }
 0x12f   :  { %1223 = vmatprep.subr.bf16.mxu1 %v1222_v8 }
 0x131   :  { %1193 = vmatpush3.bf16.msra.mxu0 %v1192_v14 }
 0x132   :  { %1225 = vmatpush3.bf16.msra.mxu1 %v1224_v16 }
 0x134   :  { %791 = vmatmul.mubr.f32.vlgmr.msra.gmra.mrb[6].mxu0 %v447_v17 }
 0x135   :  { %861 = vmatmul.mubr.f32.vlgmr.msra.gmra.mrb[6].mxu1 %v449_v12 }
 0x1e7   :  { %v926_v18 = vpop.f32.mrb[4].mxu0 }
 0x1e8   :  { %v961_v19 = vpop.f32.mrb[4].mxu1  ;;  %v927_v22 = vpop.f32.mrb[5].mxu0 }
 0x1e9   :  { %v928_v23 = vadd.f32 %v927_v22, %v926_v18  ;;  %v962_v24 = vpop.f32.mrb[5].mxu1 }
 0x1ea   :  { %v963_v20 = vadd.f32 %v962_v24, %v961_v19 }
 0x1eb   :  { %v653_v25 = vadd.f32 %v928_v23, %v893_v21 }
 0x1ed   :  { %v723_v26 = vadd.f32 %v963_v20, %v653_v25 }
 0x207   :  { %v996_v27 = vpop.f32.mrb[6].mxu0 }
 0x208   :  { %v1031_v28 = vpop.f32.mrb[6].mxu1  ;;  %v997_v29 = vpop.f32.mrb[7].mxu0 }
 0x209   :  { %v998_v31 = vadd.f32 %v997_v29, %v996_v27  ;;  %v1032_v32 = vpop.f32.mrb[7].mxu1 }
 0x20a   :  { %v1033_v33 = vadd.f32 %v1032_v32, %v1031_v28 }
 0x20b   :  { %v793_v34 = vadd.f32 %v998_v31, %v723_v26 }
 0x20d   :  { %v863_v35 = vadd.f32 %v1033_v33, %v793_v34 }
 0x20f   :  { %v869_v36 = vsel %vm868_vm1, %v863_v35, -1e+30 }
 0x210   :  { %870 = vmax.xlane.f32.xlu0 %v869_v36 }
 0x29d   :  { %v871_v37 = vpop.xlane.xlu0 %870 }
 0x29e   :  { %v872_v0 = vsub.f32 %v869_v36, %v871_v37 }
 0x2a0   :  { %v873_v38 = vmul.f32 1.442695, %v872_v0 }
 0x2a2   :  { %1233 = vpow2.f32 %v873_v38 }
 0x2ac   :  { %v1234_v39 = vpop.eup %1233 }
 0x2ad   :  { %875 = vadd.xlane.f32.xlu0 %v1234_v39 }
 0x33a   :  { %v876_v40 = vpop.xlane.xlu0 %875 }
 0x33b   :  { %1235 = vrcp.f32 %v876_v40 }
 0x33c   :  { %1237 = vtanh.f32 %v863_v35 }
 0x345   :  { %v1236_v41 = vpop.eup %1235 }
 0x346   :  { %v878_v10 = vmul.f32 %v1236_v41, %v1234_v39  ;;  %v1238_v42 = vpop.eup %1237 }
 0x348   :  { %v881_v43 = vsel %vm880_vm2, %v1238_v42, %v878_v10 }
 0x349   :  { %882 = vst [vmem:[%s1407_s5] sm:$0xff] %v881_v43 }
 0x34a   :  { %887 = vsyncpa [#allocation3], 1 }
 0x34b   :  { %888 = vsyncpa [#allocation5], 1 }

</bundles_post_ra>
